<compile_context>
chip_gen: v7x
topology: tpu7x:2x2x1
jax: 0.10.0
libtpu: 0.0.40
codegen_flags: <defaults>
</compile_context>

<pallas_src>
import functools

import jax
import jax.numpy as jnp
from jax import lax
from jax.experimental import pallas as pl
from jax.experimental.pallas import tpu as pltpu


def _attention_kernel(hproj_ref, enc_ref, w_eT_ref, v_ref, context_ref, attn_ref,
                      *, s_valid):
    # hproj_ref  : (TB, H)        f32   -- hidden @ W_h^T + b (precomputed in wrapper)
    # enc_ref    : (TB, S_pad, H) native dtype (f32 or bf16)
    # w_eT_ref   : (H, H)         same dtype as enc -- transpose of W[:, H:]
    # v_ref      : (1, H)         f32
    # context_ref: (TB, H)        f32
    # attn_ref   : (TB, S_pad)    f32
    tb, s_pad, h = enc_ref.shape
    enc = enc_ref[...]                                           # native dtype, no HBM recast

    # Encoder projection: fold batch+seq into M so one MXU matmul sees TB*S_pad rows.
    # S_pad % 8 == 0 (wrapper guarantee) -> this reshape is layout preserving.
    e_proj = jnp.dot(enc.reshape(tb * s_pad, h), w_eT_ref[...],
                     preferred_element_type=jnp.float32).reshape(tb, s_pad, h)

    # energy = tanh(e_proj + h_proj + b)   (bias already folded into hproj), f32.
    energy = jnp.tanh(e_proj + hproj_ref[...][:, None, :])       # (TB, S_pad, H)

    # scores = v . energy (contract over H): VPU multiply + XLU lane reduce,
    # keeping the MXU free for the energy matmul.
    scores = jnp.sum(energy * v_ref[...], axis=-1)               # (TB, S_pad) f32

    if s_valid != s_pad:
        # Mask out wrapper-side S padding before the softmax.
        pos = lax.broadcasted_iota(jnp.int32, (tb, s_pad), 1)
        scores = jnp.where(pos < s_valid, scores, -jnp.inf)

    # Softmax over S (lane axis of the (TB, S_pad) tile).
    m = jnp.max(scores, axis=-1, keepdims=True)
    e = jnp.exp(scores - m)
    denom = jnp.sum(e, axis=-1, keepdims=True)
    inv = pl.reciprocal(denom, approx=True)                      # EUP vrcp
    inv = inv * (2.0 - denom * inv)                              # one Newton step -> ~f32
    attn = e * inv                                               # (TB, S_pad)

    # context = attn @ enc: broadcast-multiply + sublane reduce over S (VPU/XLU),
    # accumulation in f32 regardless of the enc dtype.
    context = jnp.sum(attn[:, :, None] * enc.astype(jnp.float32), axis=1)   # (TB, H)

    context_ref[...] = context.astype(context_ref.dtype)
    attn_ref[...] = attn.astype(attn_ref.dtype)


def _round_up(x, m):
    return (x + m - 1) // m * m


def _pick_tb(batch, s_pad, h, enc_itemsize):
    """Pick batch-rows-per-grid-step by VMEM bytes (not MXU rows).

    Constraints:
      * TB divides B and (TB % 8 == 0 or TB == B)  -- (8, x) sublane rule on the
        (TB, H) / (TB, S_pad) blocks.
      * prefer >= 2 grid steps (pipelining + v7x megacore split), even count first.
      * estimated per-step VMEM stays under a conservative cross-generation budget.
    Returns (TB, vmem_estimate_bytes).
    """
    budget = 24 * 1024 * 1024          # fits v5e/v6e/v7x once vmem_limit_bytes is raised
    enc_block_cap = 4 * 1024 * 1024    # per-buffer encoder tile

    def vmem_estimate(tb):
        enc_blk = tb * s_pad * h * enc_itemsize          # one enc buffer
        interm = 4 * tb * s_pad * h * 4                  # e_proj/energy/attn*enc/f32 temps
        small = 4 * tb * h * 4 + 2 * tb * s_pad * 4      # h_proj + context + attn buffers
        const = 2 * h * h * enc_itemsize + 2 * 128 * 4   # w_eT (double-buffered) + v
        return 2 * enc_blk + interm + small + const

    cands = [d for d in range(8, batch + 1, 8) if batch % d == 0]
    cands.append(batch)
    fitting = [d for d in cands
               if vmem_estimate(d) <= budget
               and d * s_pad * h * enc_itemsize <= enc_block_cap]
    multi = [d for d in fitting if batch // d >= 2]
    even = [d for d in multi if (batch // d) % 2 == 0]
    if even:
        tb = max(even)
    elif multi:
        tb = max(multi)
    elif fitting:
        tb = max(fitting)   # grid collapses to 1 step (tiny B): no megacore split possible
    else:
        tb = min(cands)     # smallest legal block even if over budget (extreme S*H)
    return tb, vmem_estimate(tb)


def attention_forward(hidden, encoder_outputs, w, b, v):
    """JAX wrapper mirroring Attention.forward.

    hidden: (B, H), (num_layers, B, H) or (H,)
    encoder_outputs: (B, S, H)  (f32 or bf16; other dtypes are upcast to f32)
    w: (H, 2H) Linear weight (PyTorch layout), b: (H,), v: (H,)
    Returns (context (B, H) f32, attn_weights (B, S) f32).
    """
    if hidden.ndim == 3:
        hidden = hidden[-1]
    elif hidden.ndim == 1:
        hidden = hidden[None, :]

    B, S, H = encoder_outputs.shape

    # Keep encoder_outputs in its native dtype: no wrapper-side f32 pre-cast,
    # so no extra HBM read+write of the (B,S,H) tensor.
    if encoder_outputs.dtype not in (jnp.float32, jnp.bfloat16):
        encoder_outputs = encoder_outputs.astype(jnp.float32)
    mxu_dtype = encoder_outputs.dtype

    # Pad S to a multiple of 8 only when needed so the in-kernel fold never crosses
    # an (8,128) tile boundary (padded positions are masked before the softmax).
    S_pad = _round_up(S, 8)
    if S_pad != S:
        encoder_outputs = jnp.pad(encoder_outputs, ((0, 0), (0, S_pad - S), (0, 0)))

    # Split the concat-Linear: cat([h, e]) @ W^T == h @ W[:, :H]^T + e @ W[:, H:]^T
    w_hT = jnp.transpose(w[:, :H]).astype(jnp.float32)           # (H, H)
    w_eT = jnp.transpose(w[:, H:]).astype(mxu_dtype)             # (H, H), matches MXU input

    # Hoisted hidden projection + bias: one well-shaped f32 XLA matmul instead of
    # B degenerate M=1 MXU ops in the kernel (also frees one (H,H) VMEM buffer).
    h_proj = (jnp.dot(hidden.astype(jnp.float32), w_hT,
                      preferred_element_type=jnp.float32)
              + b.astype(jnp.float32)[None, :])                  # (B, H)
    v2d = v[None, :].astype(jnp.float32)                         # (1, H)

    TB, vmem_est = _pick_tb(B, S_pad, H, mxu_dtype.itemsize)
    grid = (B // TB,)
    vmem_limit = int(min(max(2 * vmem_est, 16 * 1024 * 1024), 32 * 1024 * 1024))

    kernel = functools.partial(_attention_kernel, s_valid=S)

    grid_spec = pltpu.PrefetchScalarGridSpec(
        num_scalar_prefetch=0,
        grid=grid,
        in_specs=[
            pl.BlockSpec((TB, H), lambda i: (i, 0)),             # h_proj (+bias), f32
            pl.BlockSpec((TB, S_pad, H), lambda i: (i, 0, 0)),   # encoder_outputs, native dtype
            pl.BlockSpec((H, H), lambda i: (0, 0)),              # w_eT (grid-invariant)
            pl.BlockSpec((1, H), lambda i: (0, 0)),              # v
        ],
        out_specs=[
            pl.BlockSpec((TB, H), lambda i: (i, 0)),             # context
            pl.BlockSpec((TB, S_pad), lambda i: (i, 0)),         # attn weights
        ],
    )

    context, attn_weights = pl.pallas_call(
        kernel,
        grid_spec=grid_spec,
        out_shape=(
            jax.ShapeDtypeStruct((B, H), jnp.float32),
            jax.ShapeDtypeStruct((B, S_pad), jnp.float32),
        ),
        compiler_params=pltpu.CompilerParams(
            dimension_semantics=("parallel",),                   # batch blocks over TCs (v7x)
            vmem_limit_bytes=vmem_limit),
    )(h_proj, encoder_outputs, w_eT, v2d)

    if S_pad != S:
        attn_weights = attn_weights[:, :S]
    return context, attn_weights


def _reference_forward(hidden, encoder_outputs, w, b, v):
    if hidden.ndim == 3:
        hidden = hidden[-1]
    elif hidden.ndim == 1:
        hidden = hidden[None, :]
    B, S, H = encoder_outputs.shape
    h_rep = jnp.repeat(hidden[:, None, :], S, axis=1)            # (B, S, H)
    cat = jnp.concatenate([h_rep, encoder_outputs], axis=2)      # (B, S, 2H)
    energy = jnp.tanh(jnp.einsum('bsk,hk->bsh', cat, w) + b)     # (B, S, H)
    scores = jnp.einsum('bsh,h->bs', energy, v)                  # (B, S)
    attn = jax.nn.softmax(scores, axis=1)
    context = jnp.einsum('bs,bsh->bh', attn, encoder_outputs)
    return context, attn


if __name__ == "__main__":
    B, S, H = 2, 8, 32
    key = jax.random.PRNGKey(0)
    k1, k2, k3, k4, k5 = jax.random.split(key, 5)

    # Deterministic parameter init (shapes follow nn.Linear(2H, H) and v ~ U[0,1)).
    bound = 1.0 / jnp.sqrt(2.0 * H)
    w = jax.random.uniform(k1, (H, 2 * H), jnp.float32, -bound, bound)  # Linear weight
    b = jax.random.uniform(k2, (H,), jnp.float32, -bound, bound)        # Linear bias
    v = jax.random.uniform(k3, (H,), jnp.float32, 0.0, 1.0)             # torch.rand(H)

    hidden = jax.random.normal(k4, (B, H), jnp.float32)
    encoder_outputs = jax.random.normal(k5, (B, S, H), jnp.float32)

    context, attn_weights = attention_forward(hidden, encoder_outputs, w, b, v)
    context = jax.block_until_ready(context)
    attn_weights = jax.block_until_ready(attn_weights)

    ref_ctx, ref_attn = _reference_forward(hidden, encoder_outputs, w, b, v)
    assert context.shape == (B, H) and attn_weights.shape == (B, S)
    assert jnp.allclose(context, ref_ctx, atol=2e-5, rtol=1e-5)
    assert jnp.allclose(attn_weights, ref_attn, atol=2e-5, rtol=1e-5)

    print("KERNEL_OK")
</pallas_src>

<mosaic_0001>
module attributes {stable_mosaic.version = 11 : i64} {
  func.func @_attention_kernel(%arg0: i32, %arg1: memref<2x32xf32, #tpu.memory_space<vmem>>, %arg2: memref<2x8x32xf32, #tpu.memory_space<vmem>>, %arg3: memref<32x32xf32, #tpu.memory_space<vmem>>, %arg4: memref<1x32xf32, #tpu.memory_space<vmem>>, %arg5: memref<2x32xf32, #tpu.memory_space<vmem>>, %arg6: memref<2x8xf32, #tpu.memory_space<vmem>>) attributes {dimension_semantics = [#tpu.dimension_semantics<parallel>], iteration_bounds = array<i64: 1>, scalar_prefetch = 0 : i64, scratch_operands = 0 : i64, tpu.core_type = #tpu.core_type<tc>, window_params = [{transform_indices = @transform_0, window_bounds = array<i64: 2, 32>}, {transform_indices = @transform_1, window_bounds = array<i64: 2, 8, 32>}, {pipeline_mode = #tpu.pipeline_mode<synchronous>, transform_indices = @transform_2, window_bounds = array<i64: 32, 32>}, {pipeline_mode = #tpu.pipeline_mode<synchronous>, transform_indices = @transform_3, window_bounds = array<i64: 1, 32>}, {transform_indices = @transform_4, window_bounds = array<i64: 2, 32>}, {transform_indices = @transform_5, window_bounds = array<i64: 2, 8>}]} {
    %c0 = arith.constant 0 : index
    %c0_0 = arith.constant 0 : index
    %c0_1 = arith.constant 0 : index
    %0 = vector.load %arg2[%c0, %c0_0, %c0_1] : memref<2x8x32xf32, #tpu.memory_space<vmem>>, vector<2x8x32xf32>
    %1 = vector.shape_cast %0 : vector<2x8x32xf32> to vector<16x32xf32>
    %c0_2 = arith.constant 0 : index
    %c0_3 = arith.constant 0 : index
    %2 = vector.load %arg3[%c0_2, %c0_3] : memref<32x32xf32, #tpu.memory_space<vmem>>, vector<32x32xf32>
    %cst = arith.constant dense<0.000000e+00> : vector<16x32xf32>
    %3 = tpu.matmul %1, %2, %cst {dimension_numbers = #tpu.dot_dimension_numbers<[1], [0], [0], [1], [0, 0, 1, 1], [], []>} : vector<16x32xf32>, vector<32x32xf32>, vector<16x32xf32> -> vector<16x32xf32>
    %4 = vector.shape_cast %3 : vector<16x32xf32> to vector<2x8x32xf32>
    %c0_4 = arith.constant 0 : index
    %c0_5 = arith.constant 0 : index
    %5 = vector.load %arg1[%c0_4, %c0_5] : memref<2x32xf32, #tpu.memory_space<vmem>>, vector<2x32xf32>
    %6 = vector.shape_cast %5 : vector<2x32xf32> to vector<2x1x32xf32>
    %7 = vector.broadcast %6 : vector<2x1x32xf32> to vector<2x8x32xf32>
    %8 = arith.addf %4, %7 : vector<2x8x32xf32>
    %9 = math.tanh %8 : vector<2x8x32xf32>
    %c0_6 = arith.constant 0 : index
    %c0_7 = arith.constant 0 : index
    %10 = vector.load %arg4[%c0_6, %c0_7] : memref<1x32xf32, #tpu.memory_space<vmem>>, vector<1x32xf32>
    %11 = vector.shape_cast %10 : vector<1x32xf32> to vector<1x1x32xf32>
    %12 = vector.broadcast %11 : vector<1x1x32xf32> to vector<2x8x32xf32>
    %13 = arith.mulf %9, %12 : vector<2x8x32xf32>
    %cst_8 = arith.constant dense<0.000000e+00> : vector<2x8xf32>
    %14 = vector.multi_reduction <add>, %13, %cst_8 [2] : vector<2x8x32xf32> to vector<2x8xf32>
    %cst_9 = arith.constant dense<0xFF800000> : vector<2xf32>
    %15 = vector.multi_reduction <maximumf>, %14, %cst_9 [1] : vector<2x8xf32> to vector<2xf32>
    %16 = vector.shape_cast %15 : vector<2xf32> to vector<2x1xf32>
    %17 = vector.broadcast %16 : vector<2x1xf32> to vector<2x8xf32>
    %18 = arith.subf %14, %17 : vector<2x8xf32>
    %19 = math.exp %18 : vector<2x8xf32>
    %cst_10 = arith.constant dense<0.000000e+00> : vector<2xf32>
    %20 = vector.multi_reduction <add>, %19, %cst_10 [1] : vector<2x8xf32> to vector<2xf32>
    %21 = vector.shape_cast %20 : vector<2xf32> to vector<2x1xf32>
    %22 = tpu.reciprocal %21 {approx = true} : vector<2x1xf32> -> vector<2x1xf32>
    %23 = arith.mulf %21, %22 : vector<2x1xf32>
    %cst_11 = arith.constant 2.000000e+00 : f32
    %24 = vector.broadcast %cst_11 : f32 to vector<2x1xf32>
    %25 = arith.subf %24, %23 : vector<2x1xf32>
    %26 = arith.mulf %22, %25 : vector<2x1xf32>
    %27 = vector.broadcast %26 : vector<2x1xf32> to vector<2x8xf32>
    %28 = arith.mulf %19, %27 : vector<2x8xf32>
    %29 = vector.shape_cast %28 : vector<2x8xf32> to vector<2x8x1xf32>
    %30 = vector.broadcast %29 : vector<2x8x1xf32> to vector<2x8x32xf32>
    %31 = arith.mulf %30, %0 : vector<2x8x32xf32>
    %cst_12 = arith.constant dense<0.000000e+00> : vector<2x32xf32>
    %32 = vector.multi_reduction <add>, %31, %cst_12 [1] : vector<2x8x32xf32> to vector<2x32xf32>
    %c0_13 = arith.constant 0 : index
    %c0_14 = arith.constant 0 : index
    %33 = vector.load %arg5[%c0_13, %c0_14] : memref<2x32xf32, #tpu.memory_space<vmem>>, vector<2x32xf32>
    tpu.vector_store %arg5[%c0_13, %c0_14], %32 {strides = array<i32>} : memref<2x32xf32, #tpu.memory_space<vmem>>, vector<2x32xf32>,
    %c0_15 = arith.constant 0 : index
    %c0_16 = arith.constant 0 : index
    %34 = vector.load %arg6[%c0_15, %c0_16] : memref<2x8xf32, #tpu.memory_space<vmem>>, vector<2x8xf32>
    tpu.vector_store %arg6[%c0_15, %c0_16], %28 {strides = array<i32>} : memref<2x8xf32, #tpu.memory_space<vmem>>, vector<2x8xf32>,
    return
  }
  func.func @transform_0(%arg0: i32) -> (i32, i32) {
    %c0_i32 = arith.constant 0 : i32
    %c0_i32_0 = arith.constant 0 : i32
    return %arg0, %c0_i32 : i32, i32
  }
  func.func @transform_1(%arg0: i32) -> (i32, i32, i32) {
    %c0_i32 = arith.constant 0 : i32
    %c0_i32_0 = arith.constant 0 : i32
    %c0_i32_1 = arith.constant 0 : i32
    return %arg0, %c0_i32, %c0_i32_0 : i32, i32, i32
  }
  func.func @transform_2(%arg0: i32) -> (i32, i32) {
    %c0_i32 = arith.constant 0 : i32
    %c0_i32_0 = arith.constant 0 : i32
    %c0_i32_1 = arith.constant 0 : i32
    return %c0_i32, %c0_i32_0 : i32, i32
  }
  func.func @transform_3(%arg0: i32) -> (i32, i32) {
    %c0_i32 = arith.constant 0 : i32
    %c0_i32_0 = arith.constant 0 : i32
    %c0_i32_1 = arith.constant 0 : i32
    return %c0_i32, %c0_i32_0 : i32, i32
  }
  func.func @transform_4(%arg0: i32) -> (i32, i32) {
    %c0_i32 = arith.constant 0 : i32
    %c0_i32_0 = arith.constant 0 : i32
    return %arg0, %c0_i32 : i32, i32
  }
  func.func @transform_5(%arg0: i32) -> (i32, i32) {
    %c0_i32 = arith.constant 0 : i32
    %c0_i32_0 = arith.constant 0 : i32
    return %arg0, %c0_i32 : i32, i32
  }
}

</mosaic_0001>

<bundles_post_ra>
// kernel: tpu_custom_call.1
= control target key start
LH: loop header
LB: loop body
LE: loop exit
PB: predicated region body
PF: predicated region fallthrough
CT: control target
= control target key end

     0   :  { %11 = vsyncpa [#allocation3], 0  ;;  %s657_s0 = inlined_call_operand.hbm [shape: f32[2,32], index: 0, kind: input, shape index: {}]   ;;  %s658_s1 = inlined_call_operand.hbm [shape: f32[2,8,32], index: 1, kind: input, shape index: {}]   ;;  %s659_s2 = inlined_call_operand.hbm [shape: f32[32,32], index: 2, kind: input, shape index: {}]   ;;  %s660_s3 = inlined_call_operand.vmem [shape: f32[1,32], index: 3, kind: input, shape index: {}]   ;;  %s661_s4 = inlined_call_operand.hbm [shape: f32[2,32], index: 4, kind: output, shape index: {0}]   ;;  %s662_s5 = inlined_call_operand.hbm [shape: f32[2,8], index: 5, kind: output, shape index: {1}]  }
   0x1   :  { %12 = vsyncpa [#allocation6], 0 }
   0x2   :  { %13 = vsyncpa [#allocation4], 0 }
   0x3   :  { %14 = vsyncpa [#allocation10], 0  ;;  %s516_s18 = smov [#allocation5]   ;;  %s398_s22 = scalar_lea.hbm %s658_s1, 256 }
   0x4   :  { %s30_s19 = sshll.u32 %s516_s18, 4  ;;  %p399_p0 = scmp.ne.s32.totalorder %s658_s1, %s398_s22  ;;  %s31_s19 = int_to_ptr.vmem [resolvable:$true] %s30_s19 }
   0x5   :  { %p402_p1 = scmp.lt.u32.totalorder %s398_s22, %s658_s1 }
   0x7   :  { %p404_p2 = pnand %p402_p1, %p399_p0 }
   0x9   :  { %407 = shalt.err (!%p404_p2)
}
   0xa   :  { %s408_s27 = scalar_lea.vmem %s31_s19, 256  ;;  %p413_p4 = scmp.lt.s32.totalorder %s31_s19, %s31_s19 }
   0xb   :  { %p409_p3 = scmp.ne.s32.totalorder %s31_s19, %s408_s27  ;;  %p414_p5 = scmp.lt.s32.totalorder %s408_s27, %s408_s27 }
   0xd   :  { %p415_p6 = por %p414_p5, %p413_p4 }
   0xf   :  { %p416_p7 = pnand %p415_p6, %p409_p3 }
  0x11   :  { %419 = shalt.err (!%p416_p7)
}
  0x12   :  { %s517_s28 = smov 128   ;;  %s518_s29 = smov 8  }
  0x13   :  { %36 = dma.hbm_to_vmem [thread:$0]  %s658_s1, 256, %s31_s19, [#allocation6], %s517_s28, %s517_s28, %s518_s29  }
  0x14   :  { %s519_s7 = smov [#allocation2]   ;;  %s520_s9 = smov [#allocation7]  }
  0x15   :  { %s21_s8 = sshll.u32 %s519_s7, 4  ;;  %s42_s10 = sshll.u32 %s520_s9, 4  ;;  %s22_s8 = int_to_ptr.vmem [resolvable:$true] %s21_s8  ;;  %s43_s10 = int_to_ptr.vmem [resolvable:$true] %s42_s10 }
  0x16   :  { %s420_s13 = scalar_lea.hbm %s657_s0, 32 }
  0x17   :  { %p421_p8 = scmp.ne.s32.totalorder %s657_s0, %s420_s13  ;;  %p424_p9 = scmp.lt.u32.totalorder %s420_s13, %s657_s0 }
  0x19   :  { %p426_p10 = pnand %p424_p9, %p421_p8 }
  0x1b   :  { %429 = shalt.err (!%p426_p10)
}
  0x1c   :  { %s430_s1 = scalar_lea.vmem %s22_s8, 32  ;;  %p435_p12 = scmp.lt.s32.totalorder %s22_s8, %s22_s8 }
  0x1d   :  { %p431_p11 = scmp.ne.s32.totalorder %s22_s8, %s430_s1  ;;  %p436_p13 = scmp.lt.s32.totalorder %s430_s1, %s430_s1 }
  0x1f   :  { %p437_p0 = por %p436_p13, %p435_p12 }
  0x21   :  { %p438_p1 = pnand %p437_p0, %p431_p11 }
  0x23   :  { %441 = shalt.err (!%p438_p1)
}
  0x24   :  { %24 = dma.hbm_to_vmem [thread:$0]  %s657_s0, 32, %s22_s8, [#allocation3]  }
  0x25   :  { %s442_s22 = scalar_lea.hbm %s659_s2, 512 }
  0x26   :  { %p443_p2 = scmp.ne.s32.totalorder %s659_s2, %s442_s22  ;;  %p446_p3 = scmp.lt.u32.totalorder %s442_s22, %s659_s2 }
  0x28   :  { %p448_p4 = pnand %p446_p3, %p443_p2 }
  0x2a   :  { %451 = shalt.err (!%p448_p4)
}
  0x2b   :  { %s452_s27 = scalar_lea.vmem %s43_s10, 512  ;;  %p457_p6 = scmp.lt.s32.totalorder %s43_s10, %s43_s10 }
  0x2c   :  { %p453_p5 = scmp.ne.s32.totalorder %s43_s10, %s452_s27  ;;  %p458_p7 = scmp.lt.s32.totalorder %s452_s27, %s452_s27 }
  0x2e   :  { %p459_p8 = por %p458_p7, %p457_p6 }
  0x30   :  { %p460_p9 = pnand %p459_p8, %p453_p5 }
  0x32   :  { %463 = shalt.err (!%p460_p9)
}
  0x33   :  { %48 = dma.hbm_to_vmem [thread:$0]  %s659_s2, 512, %s43_s10, [#allocation6], %s517_s28, %s517_s28, %s518_s29  }
  0x34   :  { %508 = dma.done.wait [#allocation3], 32  }
  0x35   :  { %509 = vsyncadd [#allocation3], 4294967264 }
  0x36   :  { %510 = dma.done.wait [#allocation6], 768  }
  0x37   :  { %511 = vsyncadd [#allocation6], 4294966528  ;;  %vm66_vm0 = vcmask 261120   ;;  %v62_v0 = vld [vmem:[#allocation7] sm:$0xff]  ;;  %v63_v1 = vld [vmem:[#allocation7 + $0x8] sm:$0xff]  ;;  %v161_v10 = vlaneseq  ;;  %vm213_vm1 = vcmask 1041409  }
  0x38   :  { %v64_v2 = vld [vmem:[#allocation7 + $0x10] sm:$0xff]  ;;  %v369_v3 = vpack.c.bf16 %v63_v1, %v62_v0  ;;  %v65_v4 = vld [vmem:[#allocation7 + $0x18] sm:$0xff]  ;;  %v521_v8 = vmov 1966171168   ;;  %v351_v25 = vld [vmem:[%s660_s3] ss:$0 sm:$0xff] }
  0x39   :  { %v597_v5 = vld [vmem:[#allocation5] sm:$0xff]  ;;  %v373_v6 = vpack.c.bf16 %v65_v4, %v64_v2  ;;  %v601_v7 = vld [vmem:[#allocation5 + $0x8] sm:$0xff]  ;;  %v159_v9 = vunpack.c.l.s4 %v521_v8  ;;  %v605_v12 = vshrl.u32 %v161_v10, 7  ;;  %v204_v32 = vand.u32 127, %v161_v10  ;;  %s523_s3 = smov [#allocation9]  }
  0x3a   :  { %366 = vmatprep.mubr.msk.f32.mxu0 %vm66_vm0, %v597_v5  ;;  %370 = vmatprep.subr.bf16.mxu0 %v369_v3  ;;  %v350_v13 = vld.sshfl [vmem:[#allocation2] sm:$0x11 pattern:$0x75316420]  ;;  %vm216_vm2 = vcmask 58368   ;;  %v522_v40 = vmov 0  }
  0x3b   :  { %372 = vmatpush3.bf16.msra.mxu0 %v369_v3  ;;  %v160_v11 = vunpack.c.0.s8 %v159_v9  ;;  %v157_v14 = vcombine.high %v350_v13, %v350_v13  ;;  %v609_v17 = vsub.s32 0, %v605_v12  ;;  %v207_v34 = vsub.s32 %v204_v32, %v605_v12  ;;  %387 = vset.pattern.permute.xlu0 %v522_v40  ;;  %s334_s29 = sshll.u32 %s523_s3, 4  ;;  %s335_s29 = int_to_ptr.vmem [resolvable:$true] %s334_s29 }
  0x3c   :  { %374 = vmatprep.subr.bf16.mxu0 %v373_v6  ;;  %386 = vset.pattern.permute.xlu1 %v522_v40  ;;  %v227_v41 = vsub.s32 1, %v605_v12  ;;  %s464_s6 = scalar_lea.vmem %s335_s29, 32  ;;  %p469_p11 = scmp.lt.s32.totalorder %s335_s29, %s335_s29 }
  0x3d   :  { %v163_v15 = vsub.s32 %v160_v11, %v605_v12  ;;  %p465_p10 = scmp.ne.s32.totalorder %s335_s29, %s464_s6  ;;  %p470_p12 = scmp.lt.s32.totalorder %s464_s6, %s464_s6 }
  0x3f   :  { %376 = vmatpush3.bf16.msra.mxu0 %v373_v6  ;;  %v171_v16 = vrot.slane %v157_v14, %v163_v15  ;;  %v164_v18 = vrot.slane %v350_v13, %v163_v15  ;;  %p471_p13 = por %p470_p12, %p469_p11 }
  0x41   :  { %v179_v19 = vrot.slane %v171_v16, %v609_v17  ;;  %v175_v20 = vrot.slane %v164_v18, %v609_v17  ;;  %p472_p0 = pnand %p471_p13, %p465_p10 }
  0x42   :  { %367 = vmatmul.mubr.msk.f32.vlgmr.msra.gmra.mrb[0].mxu0 %vm66_vm0, %v601_v7 }
 0x115   :  { %v368_v21 = vpop.f32.mrb[0].mxu0 }
 0x116   :  { %v183_v22 = vadd.f32 %v368_v21, %v179_v19  ;;  %v139_v23 = vpop.f32.mrb[1].mxu0 }
 0x117   :  { %v182_v24 = vadd.f32 %v175_v20, %v139_v23 }
 0x118   :  { %388 = vtanh.f32 %v183_v22 }
 0x119   :  { %390 = vtanh.f32 %v182_v24 }
 0x122   :  { %v389_v26 = vpop.eup %388 }
 0x123   :  { %v391_v27 = vpop.eup %390  ;;  %v194_v30 = vmul.f32 %v389_v26, %v351_v25 }
 0x124   :  { %v193_v28 = vmul.f32 %v391_v27, %v351_v25 }
 0x125   :  { %v198_v31 = vsel %vm66_vm0, %v194_v30, 0.0 }
 0x126   :  { %v195_v29 = vsel %vm66_vm0, %v193_v28, 0.0 }
 0x127   :  { %196 = vadd.xlane.f32.xlu0 %v195_v29 }
 0x12b   :  { %199 = vadd.xlane.f32.xlu0 %v198_v31 }
 0x1b4   :  { %v197_v33 = vpop.xlane.xlu0 %196 }
 0x1b5   :  { %v208_v36 = vrot.slane %v197_v33, %v207_v34 }
 0x1b8   :  { %v200_v35 = vpop.xlane.xlu0 %199 }
 0x1b9   :  { %v212_v37 = vrot.slane %v200_v35, %v207_v34 }
 0x1bb   :  { %v214_v38 = vsel %vm213_vm1, %v212_v37, %v208_v36 }
 0x1bc   :  { %v217_v39 = vsel %vm216_vm2, %v214_v38, -inf }
 0x1bd   :  { %218 = vmax.xlane.f32.xlu1 %v217_v39 }
 0x24a   :  { %v219_v42 = vpop.xlane.xlu1 %218 }
 0x24b   :  { %v224_v43 = vrot.slane %v219_v42, %v609_v17  ;;  %v228_v44 = vrot.slane %v219_v42, %v227_v41 }
 0x24d   :  { %v231_v45 = vsub.f32 %v197_v33, %v224_v43  ;;  %v232_v46 = vsub.f32 %v200_v35, %v228_v44 }
 0x24f   :  { %v233_v47 = vmul.f32 1.442695, %v231_v45  ;;  %v235_v48 = vmul.f32 1.442695, %v232_v46 }
 0x251   :  { %392 = vpow2.f32 %v233_v47 }
 0x252   :  { %394 = vpow2.f32 %v235_v48 }
 0x25b   :  { %v393_v49 = vpop.eup %392 }
 0x25c   :  { %v395_v50 = vpop.eup %394  ;;  %240 = vperm.xlu1 %386, %v393_v49  }
 0x25d   :  { %243 = vperm.xlu0 %387, %v395_v50  }
 0x2db   :  { %v241_v51 = vpop.permute.xlu1 %240 }
 0x2dc   :  { %v244_v52 = vpop.permute.xlu0 %243  ;;  %v248_v53 = vrot.slane %v241_v51, %v207_v34 }
 0x2dd   :  { %v252_v54 = vrot.slane %v244_v52, %v207_v34 }
 0x2df   :  { %v253_v55 = vsel %vm213_vm1, %v252_v54, %v248_v53 }
 0x2e0   :  { %v255_v56 = vsel %vm216_vm2, %v253_v55, 0.0 }
 0x2e1   :  { %256 = vadd.xlane.f32.xlu1 %v255_v56 }
 0x36e   :  { %v257_v57 = vpop.xlane.xlu1 %256 }
 0x36f   :  { %396 = vrcp.f32 %v257_v57 }
 0x379   :  { %v397_v58 = vpop.eup %396 }
 0x37a   :  { %v259_v59 = vmul.f32 %v397_v58, %v257_v57 }
 0x37c   :  { %v260_v60 = vsub.f32 2.0, %v259_v59 }
 0x37e   :  { %v261_v61 = vmul.f32 %v397_v58, %v260_v60 }
 0x380   :  { %v266_v62 = vrot.slane %v261_v61, %v609_v17  ;;  %v270_v63 = vrot.slane %v261_v61, %v227_v41 }
 0x382   :  { %v273_v0 = vmul.f32 %v393_v49, %v266_v62  ;;  %v274_v1 = vmul.f32 %v395_v50, %v270_v63 }
 0x384   :  { %277 = vperm.xlu0 %387, %v273_v0  }
 0x388   :  { %282 = vperm.xlu0 %387, %v274_v1  }
 0x403   :  { %v278_v2 = vpop.permute.xlu0 %277 }
 0x404   :  { %v285_v3 = vmul.f32 %v278_v2, %v597_v5  ;;  %v310_v9 = vrot.slane %v278_v2, %v207_v34 }
 0x406   :  { %v287_v4 = vsel %vm66_vm0, %v285_v3, 0.0 }
 0x407   :  { %v288_v6 = vrot.slane %v287_v4, 4  ;;  %v283_v8 = vpop.permute.xlu0 %282 }
 0x408   :  { %v286_v10 = vmul.f32 %v283_v8, %v601_v7  ;;  %v314_v11 = vrot.slane %v283_v8, %v207_v34 }
 0x409   :  { %v289_v12 = vadd.f32 %v288_v6, %v287_v4 }
 0x40a   :  { %v294_v13 = vsel %vm66_vm0, %v286_v10, 0.0  ;;  %v315_v14 = vsel %vm213_vm1, %v314_v11, %v310_v9 }
 0x40b   :  { %v290_v15 = vrot.slane %v289_v12, 2  ;;  %v295_v16 = vrot.slane %v294_v13, 4  ;;  %317 = vst.msk [vmem:[#allocation9] sm:$0x3] %vm216_vm2, %v315_v14 }
 0x40c   :  { %475 = shalt.err (!%p472_p0)
}
 0x40d   :  { %s476_s9 = scalar_lea.hbm %s662_s5, 32 }
 0x40e   :  { %p477_p1 = scmp.ne.s32.totalorder %s662_s5, %s476_s9  ;;  %p480_p2 = scmp.lt.u32.totalorder %s476_s9, %s662_s5 }
 0x410   :  { %p482_p3 = pnand %p480_p2, %p477_p1 }
 0x412   :  { %485 = shalt.err (!%p482_p3)
}
 0x413   :  { %337 = dma.vmem_to_hbm [thread:$0]  %s335_s29, 32, %s662_s5, [#allocation10]   ;;  %v291_v5 = vadd.f32 %v290_v15, %v289_v12  ;;  %v296_v7 = vadd.f32 %v295_v16, %v294_v13  ;;  %vm305_vm3 = vcmask 254976  }
 0x414   :  { %s524_s16 = smov [#allocation8]  }
 0x415   :  { %v297_v17 = vrot.slane %v296_v7, 2  ;;  %v292_v18 = vrot.slane %v291_v5, 1  ;;  %s324_s17 = sshll.u32 %s524_s16, 4  ;;  %s325_s17 = int_to_ptr.vmem [resolvable:$true] %s324_s17 }
 0x416   :  { %s486_s1 = scalar_lea.vmem %s325_s17, 32  ;;  %p491_p5 = scmp.lt.s32.totalorder %s325_s17, %s325_s17 }
 0x417   :  { %v298_v19 = vadd.f32 %v297_v17, %v296_v7  ;;  %v293_v22 = vadd.f32 %v292_v18, %v291_v5  ;;  %p487_p4 = scmp.ne.s32.totalorder %s325_s17, %s486_s1  ;;  %p492_p6 = scmp.lt.s32.totalorder %s486_s1, %s486_s1 }
 0x419   :  { %v299_v20 = vrot.slane %v298_v19, 1  ;;  %p493_p7 = por %p492_p6, %p491_p5 }
 0x41b   :  { %v300_v21 = vadd.f32 %v299_v20, %v298_v19  ;;  %p494_p8 = pnand %p493_p7, %p487_p4 }
 0x41d   :  { %v303_v23 = vsel %vm213_vm1, %v300_v21, %v293_v22 }
 0x41e   :  { %306 = vst.msk [vmem:[#allocation8] sm:$0x3] %vm305_vm3, %v303_v23 }
 0x41f   :  { %497 = shalt.err (!%p494_p8)
}
 0x420   :  { %s498_s19 = scalar_lea.hbm %s661_s4, 32 }
 0x421   :  { %p499_p9 = scmp.ne.s32.totalorder %s661_s4, %s498_s19  ;;  %p502_p10 = scmp.lt.u32.totalorder %s498_s19, %s661_s4 }
 0x423   :  { %p504_p11 = pnand %p502_p10, %p499_p9 }
 0x425   :  { %507 = shalt.err (!%p504_p11)
}
 0x426   :  { %327 = dma.vmem_to_hbm [thread:$0]  %s325_s17, 32, %s661_s4, [#allocation4]  }
 0x427   :  { %512 = dma.done.wait [#allocation4], 32  }
 0x428   :  { %513 = vsyncadd [#allocation4], 4294967264 }
 0x429   :  { %514 = dma.done.wait [#allocation10], 32  }
 0x42a   :  { %515 = vsyncadd [#allocation10], 4294967264 }
 0x42b   :  { %344 = vsyncpa [#allocation3], 1 }
 0x42c   :  { %345 = vsyncpa [#allocation6], 1 }
 0x42d   :  { %346 = vsyncpa [#allocation4], 1 }
 0x42e   :  { %347 = vsyncpa [#allocation10], 1 }

</bundles_post_ra>
